<compile_context>
chip_gen: v6e
topology: v6e:2x2x1
jax: 0.10.0
libtpu: 0.0.40
codegen_flags: <defaults>
</compile_context>

<pallas_src>
import functools

import jax
import jax.numpy as jnp
from jax.experimental import pallas as pl
from jax.experimental.pallas import tpu as pltpu


def _round_up(x, m):
    return ((x + m - 1) // m) * m


def _hn_loss_kernel(img_ref, pos_ref, neg_ref, mask_ref, o_ref,
                    num_ref, den_ref, *, alpha, tile, off, vg):
    """One vg-tile of the fused HNLoss reduction.

    img_ref : [tile, Q, D] tile of the FULL image_features array (block index
              offset by `first_block` in the wrapper's index_map).
    pos_ref / neg_ref : [tile, D] rows of the front-padded pos/neg text
              features, aligned so local row r matches img row r.
    mask_ref: [tile, 1] front-padded ignore_mask (padding rows are 0).
    o_ref   : [1, 1] final scalar loss, written only on the last grid step.
    num_ref / den_ref : [1, 1] f32 scratch accumulators (persist across grid).
    """
    j = pl.program_id(0)

    @pl.when(j == 0)
    def _init():
        num_ref[...] = jnp.zeros_like(num_ref)
        den_ref[...] = jnp.zeros_like(den_ref)

    img = img_ref[...]                        # [tile, Q, D], input dtype
    pos = pos_ref[...]                        # [tile, D]
    neg = neg_ref[...]                        # [tile, D]
    mask = mask_ref[...].astype(jnp.float32)  # [tile, 1]

    # Both score tensors from one pass over the resident img tile. Multiply in
    # the input dtype (bf16 stays bf16 on v6e/v7x), accumulate the D-reduction
    # in f32. Batched mat-vec has N=1, so VPU multiply + lane reduce is the
    # right unit mix for D >= 128.
    # TODO(synk): for deployments with D < 128 a single MXU matmul
    # ([vg*Q, D] x [D, 2*vg] + block-diagonal select) would be lane-dense; for
    # real Q-Former D=256 this VPU path is already dense.
    s_pos = jnp.sum(img * pos[:, None, :], axis=-1, dtype=jnp.float32)  # [tile, Q]
    s_neg = jnp.sum(img * neg[:, None, :], axis=-1, dtype=jnp.float32)  # [tile, Q]

    pos_sim = jnp.max(s_pos, axis=-1, keepdims=True)   # [tile, 1]
    neg_sim = jnp.max(s_neg, axis=-1, keepdims=True)   # [tile, 1]

    # -log(exp(p)/(exp(p)+exp(n))) == softplus(n - p), in the overflow-safe
    # form: one exp + one log instead of 2x exp + divide + log.
    x = neg_sim - pos_sim
    loss = jnp.maximum(x, 0.0) + jnp.log(1.0 + jnp.exp(-jnp.abs(x)))  # [tile, 1]

    # Row validity: which rows of this tile are real VG samples. Guards the
    # non-VG prefix rows of the first block and the (possibly garbage-filled)
    # padded rows of a ragged last block from poisoning the sums.
    r = jax.lax.broadcasted_iota(jnp.int32, (tile, 1), 0)
    sample = j * tile + r - off
    valid = jnp.logical_and(sample >= 0, sample < vg)
    w = jnp.where(valid, mask, 0.0)

    num_ref[...] += jnp.sum(jnp.where(valid, loss, 0.0) * w,
                            axis=0, keepdims=True)
    den_ref[...] += jnp.sum(w, axis=0, keepdims=True)

    @pl.when(j == pl.num_programs(0) - 1)
    def _finalize():
        # Mirrors the reference exactly: NaN if sum(ignore_mask) == 0.
        o_ref[...] = (alpha * num_ref[...] / den_ref[...]).astype(o_ref.dtype)


def _sanitize_tile(t, b_img):
    t = int(max(1, t))
    if t >= b_img:
        return b_img          # single block covering the whole image array
    t = max(8, (t // 8) * 8)  # multi-block path: 8-row (sublane) alignment
    if t >= b_img:
        return b_img
    return t


def _choose_tile(vg, b_img, q, d, itemsize):
    # ~2 MiB img block keeps the 2x double-buffered inputs far below the
    # 32 MiB default-scoped VMEM budget (v7x: 64 MiB physical / 32 MiB scoped).
    row_bytes = max(1, q * d * itemsize)
    t = (2 * 1024 * 1024) // row_bytes
    t = int(max(8, min(256, t)))
    t = max(8, (t // 8) * 8)
    t = min(t, _round_up(vg, 8))   # no point tiling finer than the vg extent
    return _sanitize_tile(t, b_img)


def hn_loss(image_features, text_features, ignore_mask, vg_batch_size,
            alpha=1.0, *, tile_vg=None):
    """HNLoss forward.

    image_features: [B_img, Q, D] (only the last vg rows are used)
    text_features:  [B_txt, D] (rows [-2vg:-vg] positives, [-vg:] negatives)
    ignore_mask:    [vg] float weights
    Returns the scalar f32 loss.
    """
    vg = int(vg_batch_size)
    b_img, q, d = image_features.shape
    b_txt, d_txt = text_features.shape
    assert d_txt == d and 1 <= vg <= b_img and b_txt >= 2 * vg

    itemsize = jnp.dtype(image_features.dtype).itemsize
    if tile_vg is None:
        tile = _choose_tile(vg, b_img, q, d, itemsize)
    else:
        tile = _sanitize_tile(tile_vg, b_img)

    # The dominant [vg, Q, D] slab is consumed directly from the full HBM
    # array: the img index_map below is statically offset by `first_block`, so
    # no wrapper-side suffix-slice copy of image_features is materialized.
    img_start = b_img - vg
    first_block = img_start // tile
    off = img_start - first_block * tile        # non-VG prefix rows in block 0
    last_block = (b_img - 1) // tile
    num_grid = last_block - first_block + 1
    padded_len = num_grid * tile
    pad_tail = padded_len - off - vg            # always >= 0

    # Text/mask are tiny (vg*D, vg): slice + front-pad by `off` rows so local
    # row r of every tile lines up with img row r of the same tile.
    pos_txt = text_features[b_txt - 2 * vg:b_txt - vg, :]
    neg_txt = text_features[b_txt - vg:, :]
    mask2d = ignore_mask.reshape(vg, 1).astype(jnp.float32)
    pos_pad = jnp.pad(pos_txt, ((off, pad_tail), (0, 0)))
    neg_pad = jnp.pad(neg_txt, ((off, pad_tail), (0, 0)))
    mask_pad = jnp.pad(mask2d, ((off, pad_tail), (0, 0)))

    kernel = functools.partial(_hn_loss_kernel, alpha=float(alpha),
                               tile=tile, off=off, vg=vg)

    cost = pl.CostEstimate(
        flops=4 * vg * q * d + 12 * vg,      # two fused score tensors + tail
        transcendentals=2 * vg,              # softplus: one exp + one log / sample
        bytes_accessed=(vg * q * d + 2 * vg * d) * itemsize + vg * 4 + 4,
    )

    grid_spec = pltpu.PrefetchScalarGridSpec(
        num_scalar_prefetch=0,
        grid=(num_grid,),
        in_specs=[
            pl.BlockSpec((tile, q, d), lambda j: (first_block + j, 0, 0)),
            pl.BlockSpec((tile, d), lambda j: (j, 0)),
            pl.BlockSpec((tile, d), lambda j: (j, 0)),
            pl.BlockSpec((tile, 1), lambda j: (j, 0)),
        ],
        out_specs=pl.BlockSpec((1, 1), lambda j: (0, 0)),
        scratch_shapes=[pltpu.VMEM((1, 1), jnp.float32),
                        pltpu.VMEM((1, 1), jnp.float32)],
    )

    # TODO(synk): on v7x a leading size-2 "parallel" grid axis could split the
    # vg tiles across both TensorCores (partial num/den summed in the
    # wrapper); skipped because realistic HNLoss vg batches are too small to
    # pay for the extra output.
    out = pl.pallas_call(
        kernel,
        out_shape=jax.ShapeDtypeStruct((1, 1), jnp.float32),
        grid_spec=grid_spec,
        compiler_params=pltpu.CompilerParams(
            dimension_semantics=("arbitrary",)),  # reduction axis
        cost_estimate=cost,
    )(image_features, pos_pad, neg_pad, mask_pad)
    return out[0, 0]


def _reference_hn_loss(image_features, text_features, ignore_mask,
                       vg_batch_size, alpha=1.0):
    vg = int(vg_batch_size)
    vg_img = image_features[-vg:, :, :]
    pos_txt = text_features[-2 * vg:-vg, :]
    neg_txt = text_features[-vg:, :]
    pos_sim = jnp.max(jnp.einsum("bqd,bd->bq", vg_img, pos_txt), axis=-1)
    neg_sim = jnp.max(jnp.einsum("bqd,bd->bq", vg_img, neg_txt), axis=-1)
    p = jnp.exp(pos_sim)
    n = jnp.exp(neg_sim)
    lps = -jnp.log(p / (p + n))
    return alpha * jnp.dot(lps, ignore_mask) / jnp.sum(ignore_mask)


if __name__ == "__main__":
    key = jax.random.PRNGKey(0)
    k_img, k_txt = jax.random.split(key)

    # Small BLIP-2 Q-Former-style shapes: Q query tokens per image; the last
    # vg rows of text_features are hard negatives, the vg before them
    # positives.
    b_img, q, d = 16, 8, 32
    vg_batch_size = 12
    b_txt = 2 * vg_batch_size + 4
    alpha = 1.0

    image_features = jax.random.normal(k_img, (b_img, q, d), jnp.float32)
    image_features = image_features / jnp.linalg.norm(
        image_features, axis=-1, keepdims=True)
    text_features = jax.random.normal(k_txt, (b_txt, d), jnp.float32)
    text_features = text_features / jnp.linalg.norm(
        text_features, axis=-1, keepdims=True)
    ignore_mask = jnp.array([1, 0, 1, 1, 1, 0, 1, 1, 1, 1, 0, 1], jnp.float32)

    ref = _reference_hn_loss(image_features, text_features, ignore_mask,
                             vg_batch_size, alpha)

    # Multi-tile path: tile_vg=8 -> 2 pipelined vg tiles + scratch accumulators.
    loss_tiled = hn_loss(image_features, text_features, ignore_mask,
                         vg_batch_size, alpha, tile_vg=8)
    loss_tiled = jax.block_until_ready(loss_tiled)
    assert loss_tiled.shape == (), loss_tiled.shape
    assert jnp.allclose(loss_tiled, ref, atol=1e-5, rtol=1e-5), (loss_tiled, ref)

    # Auto tile: single resident block at these tiny shapes.
    loss_auto = hn_loss(image_features, text_features, ignore_mask,
                        vg_batch_size, alpha)
    loss_auto = jax.block_until_ready(loss_auto)
    assert jnp.allclose(loss_auto, ref, atol=1e-5, rtol=1e-5), (loss_auto, ref)

    print("KERNEL_OK")
</pallas_src>

<mosaic_0001>
module attributes {stable_mosaic.version = 11 : i64} {
  func.func @_hn_loss_kernel(%arg0: i32, %arg1: memref<8x8x32xf32, #tpu.memory_space<vmem>>, %arg2: memref<8x32xf32, #tpu.memory_space<vmem>>, %arg3: memref<8x32xf32, #tpu.memory_space<vmem>>, %arg4: memref<8x1xf32, #tpu.memory_space<vmem>>, %arg5: memref<1x1xf32, #tpu.memory_space<vmem>>, %arg6: memref<1x1xf32, #tpu.memory_space<vmem>>, %arg7: memref<1x1xf32, #tpu.memory_space<vmem>>) attributes {dimension_semantics = [#tpu.dimension_semantics<arbitrary>], iteration_bounds = array<i64: 2>, scalar_prefetch = 0 : i64, scratch_operands = 2 : i64, tpu.core_type = #tpu.core_type<tc>, window_params = [{transform_indices = @transform_0, window_bounds = array<i64: 8, 8, 32>}, {transform_indices = @transform_1, window_bounds = array<i64: 8, 32>}, {transform_indices = @transform_2, window_bounds = array<i64: 8, 32>}, {transform_indices = @transform_3, window_bounds = array<i64: 8, 1>}, {pipeline_mode = #tpu.pipeline_mode<synchronous>, transform_indices = @transform_4, window_bounds = array<i64: 1, 1>}]} {
    %c0_i32 = arith.constant 0 : i32
    %0 = arith.cmpi eq, %arg0, %c0_i32 : i32
    %1 = arith.extui %0 : i1 to i32
    %c0_i32_0 = arith.constant 0 : i32
    %2 = arith.cmpi ne, %1, %c0_i32_0 : i32
    scf.if %2 {
      %cst_29 = arith.constant 0.000000e+00 : f32
      %59 = vector.broadcast %cst_29 : f32 to vector<1x1xf32>
      %c0_30 = arith.constant 0 : index
      %c0_31 = arith.constant 0 : index
      %60 = vector.load %arg6[%c0_30, %c0_31] : memref<1x1xf32, #tpu.memory_space<vmem>>, vector<1x1xf32>
      tpu.vector_store %arg6[%c0_30, %c0_31], %59 {strides = array<i32>} : memref<1x1xf32, #tpu.memory_space<vmem>>, vector<1x1xf32>,
      %cst_32 = arith.constant 0.000000e+00 : f32
      %61 = vector.broadcast %cst_32 : f32 to vector<1x1xf32>
      %c0_33 = arith.constant 0 : index
      %c0_34 = arith.constant 0 : index
      %62 = vector.load %arg7[%c0_33, %c0_34] : memref<1x1xf32, #tpu.memory_space<vmem>>, vector<1x1xf32>
      tpu.vector_store %arg7[%c0_33, %c0_34], %61 {strides = array<i32>} : memref<1x1xf32, #tpu.memory_space<vmem>>, vector<1x1xf32>,
    } else {
    }
    %c0 = arith.constant 0 : index
    %c0_1 = arith.constant 0 : index
    %c0_2 = arith.constant 0 : index
    %3 = vector.load %arg1[%c0, %c0_1, %c0_2] : memref<8x8x32xf32, #tpu.memory_space<vmem>>, vector<8x8x32xf32>
    %c0_3 = arith.constant 0 : index
    %c0_4 = arith.constant 0 : index
    %4 = vector.load %arg2[%c0_3, %c0_4] : memref<8x32xf32, #tpu.memory_space<vmem>>, vector<8x32xf32>
    %c0_5 = arith.constant 0 : index
    %c0_6 = arith.constant 0 : index
    %5 = vector.load %arg3[%c0_5, %c0_6] : memref<8x32xf32, #tpu.memory_space<vmem>>, vector<8x32xf32>
    %c0_7 = arith.constant 0 : index
    %c0_8 = arith.constant 0 : index
    %6 = vector.load %arg4[%c0_7, %c0_8] : memref<8x1xf32, #tpu.memory_space<vmem>>, vector<8x1xf32>
    %7 = vector.shape_cast %4 : vector<8x32xf32> to vector<8x1x32xf32>
    %8 = vector.broadcast %7 : vector<8x1x32xf32> to vector<8x8x32xf32>
    %9 = arith.mulf %3, %8 : vector<8x8x32xf32>
    %cst = arith.constant dense<0.000000e+00> : vector<8x8xf32>
    %10 = vector.multi_reduction <add>, %9, %cst [2] : vector<8x8x32xf32> to vector<8x8xf32>
    %11 = vector.shape_cast %5 : vector<8x32xf32> to vector<8x1x32xf32>
    %12 = vector.broadcast %11 : vector<8x1x32xf32> to vector<8x8x32xf32>
    %13 = arith.mulf %3, %12 : vector<8x8x32xf32>
    %cst_9 = arith.constant dense<0.000000e+00> : vector<8x8xf32>
    %14 = vector.multi_reduction <add>, %13, %cst_9 [2] : vector<8x8x32xf32> to vector<8x8xf32>
    %cst_10 = arith.constant dense<0xFF800000> : vector<8xf32>
    %15 = vector.multi_reduction <maximumf>, %10, %cst_10 [1] : vector<8x8xf32> to vector<8xf32>
    %16 = vector.shape_cast %15 : vector<8xf32> to vector<8x1xf32>
    %cst_11 = arith.constant dense<0xFF800000> : vector<8xf32>
    %17 = vector.multi_reduction <maximumf>, %14, %cst_11 [1] : vector<8x8xf32> to vector<8xf32>
    %18 = vector.shape_cast %17 : vector<8xf32> to vector<8x1xf32>
    %19 = arith.subf %18, %16 : vector<8x1xf32>
    %cst_12 = arith.constant 0.000000e+00 : f32
    %20 = vector.broadcast %cst_12 : f32 to vector<8x1xf32>
    %21 = arith.maximumf %19, %20 : vector<8x1xf32>
    %22 = math.absf %19 : vector<8x1xf32>
    %cst_13 = arith.constant 0.000000e+00 : f32
    %23 = vector.broadcast %cst_13 : f32 to vector<8x1xf32>
    %24 = arith.subf %23, %22 : vector<8x1xf32>
    %25 = math.exp %24 : vector<8x1xf32>
    %cst_14 = arith.constant 1.000000e+00 : f32
    %26 = vector.broadcast %cst_14 : f32 to vector<8x1xf32>
    %27 = arith.addf %26, %25 : vector<8x1xf32>
    %28 = math.log %27 : vector<8x1xf32>
    %29 = arith.addf %21, %28 : vector<8x1xf32>
    %30 = tpu.iota {dimensions = array<i32: 0>} : vector<8x1xi32>
    %c8_i32 = arith.constant 8 : i32
    %31 = arith.muli %arg0, %c8_i32 : i32
    %32 = vector.broadcast %31 : i32 to vector<8x1xi32>
    %33 = arith.addi %32, %30 : vector<8x1xi32>
    %c4_i32 = arith.constant 4 : i32
    %34 = vector.broadcast %c4_i32 : i32 to vector<8x1xi32>
    %35 = arith.subi %33, %34 : vector<8x1xi32>
    %c0_i32_15 = arith.constant 0 : i32
    %36 = vector.broadcast %c0_i32_15 : i32 to vector<8x1xi32>
    %37 = arith.cmpi sge, %35, %36 : vector<8x1xi32>
    %c12_i32 = arith.constant 12 : i32
    %38 = vector.broadcast %c12_i32 : i32 to vector<8x1xi32>
    %39 = arith.cmpi slt, %35, %38 : vector<8x1xi32>
    %40 = arith.andi %37, %39 : vector<8x1xi1>
    %cst_16 = arith.constant 0.000000e+00 : f32
    %41 = vector.broadcast %cst_16 : f32 to vector<8x1xf32>
    %42 = arith.select %40, %6, %41 : vector<8x1xi1>, vector<8x1xf32>
    %c0_17 = arith.constant 0 : index
    %c0_18 = arith.constant 0 : index
    %43 = vector.load %arg6[%c0_17, %c0_18] : memref<1x1xf32, #tpu.memory_space<vmem>>, vector<1x1xf32>
    %cst_19 = arith.constant 0.000000e+00 : f32
    %44 = vector.broadcast %cst_19 : f32 to vector<8x1xf32>
    %45 = arith.select %40, %29, %44 : vector<8x1xi1>, vector<8x1xf32>
    %46 = arith.mulf %45, %42 : vector<8x1xf32>
    %cst_20 = arith.constant dense<0.000000e+00> : vector<1xf32>
    %47 = vector.multi_reduction <add>, %46, %cst_20 [0] : vector<8x1xf32> to vector<1xf32>
    %48 = vector.shape_cast %47 : vector<1xf32> to vector<1x1xf32>
    %49 = arith.addf %43, %48 : vector<1x1xf32>
    %c0_21 = arith.constant 0 : index
    %c0_22 = arith.constant 0 : index
    %50 = vector.load %arg6[%c0_21, %c0_22] : memref<1x1xf32, #tpu.memory_space<vmem>>, vector<1x1xf32>
    tpu.vector_store %arg6[%c0_21, %c0_22], %49 {strides = array<i32>} : memref<1x1xf32, #tpu.memory_space<vmem>>, vector<1x1xf32>,
    %c0_23 = arith.constant 0 : index
    %c0_24 = arith.constant 0 : index
    %51 = vector.load %arg7[%c0_23, %c0_24] : memref<1x1xf32, #tpu.memory_space<vmem>>, vector<1x1xf32>
    %cst_25 = arith.constant dense<0.000000e+00> : vector<1xf32>
    %52 = vector.multi_reduction <add>, %42, %cst_25 [0] : vector<8x1xf32> to vector<1xf32>
    %53 = vector.shape_cast %52 : vector<1xf32> to vector<1x1xf32>
    %54 = arith.addf %51, %53 : vector<1x1xf32>
    %c0_26 = arith.constant 0 : index
    %c0_27 = arith.constant 0 : index
    %55 = vector.load %arg7[%c0_26, %c0_27] : memref<1x1xf32, #tpu.memory_space<vmem>>, vector<1x1xf32>
    tpu.vector_store %arg7[%c0_26, %c0_27], %54 {strides = array<i32>} : memref<1x1xf32, #tpu.memory_space<vmem>>, vector<1x1xf32>,
    %c1_i32 = arith.constant 1 : i32
    %56 = arith.cmpi eq, %arg0, %c1_i32 : i32
    %57 = arith.extui %56 : i1 to i32
    %c0_i32_28 = arith.constant 0 : i32
    %58 = arith.cmpi ne, %57, %c0_i32_28 : i32
    scf.if %58 {
      %c0_29 = arith.constant 0 : index
      %c0_30 = arith.constant 0 : index
      %59 = vector.load %arg6[%c0_29, %c0_30] : memref<1x1xf32, #tpu.memory_space<vmem>>, vector<1x1xf32>
      %cst_31 = arith.constant 1.000000e+00 : f32
      %60 = vector.broadcast %cst_31 : f32 to vector<1x1xf32>
      %61 = arith.mulf %60, %59 : vector<1x1xf32>
      %c0_32 = arith.constant 0 : index
      %c0_33 = arith.constant 0 : index
      %62 = vector.load %arg7[%c0_32, %c0_33] : memref<1x1xf32, #tpu.memory_space<vmem>>, vector<1x1xf32>
      %63 = arith.divf %61, %62 : vector<1x1xf32>
      %c0_34 = arith.constant 0 : index
      %c0_35 = arith.constant 0 : index
      %64 = vector.load %arg5[%c0_34, %c0_35] : memref<1x1xf32, #tpu.memory_space<vmem>>, vector<1x1xf32>
      tpu.vector_store %arg5[%c0_34, %c0_35], %63 {strides = array<i32>} : memref<1x1xf32, #tpu.memory_space<vmem>>, vector<1x1xf32>,
    } else {
    }
    return
  }
  func.func @transform_0(%arg0: i32) -> (i32, i32, i32) {
    %c0_i32 = arith.constant 0 : i32
    %0 = arith.addi %c0_i32, %arg0 : i32
    %c0_i32_0 = arith.constant 0 : i32
    %c0_i32_1 = arith.constant 0 : i32
    %c0_i32_2 = arith.constant 0 : i32
    return %0, %c0_i32_0, %c0_i32_1 : i32, i32, i32
  }
  func.func @transform_1(%arg0: i32) -> (i32, i32) {
    %c0_i32 = arith.constant 0 : i32
    %c0_i32_0 = arith.constant 0 : i32
    return %arg0, %c0_i32 : i32, i32
  }
  func.func @transform_2(%arg0: i32) -> (i32, i32) {
    %c0_i32 = arith.constant 0 : i32
    %c0_i32_0 = arith.constant 0 : i32
    return %arg0, %c0_i32 : i32, i32
  }
  func.func @transform_3(%arg0: i32) -> (i32, i32) {
    %c0_i32 = arith.constant 0 : i32
    %c0_i32_0 = arith.constant 0 : i32
    return %arg0, %c0_i32 : i32, i32
  }
  func.func @transform_4(%arg0: i32) -> (i32, i32) {
    %c0_i32 = arith.constant 0 : i32
    %c0_i32_0 = arith.constant 0 : i32
    %c0_i32_1 = arith.constant 0 : i32
    return %c0_i32, %c0_i32_0 : i32, i32
  }
}

</mosaic_0001>

<bundles_post_ra>
// kernel: tpu_custom_call.1
= control target key start
LH: loop header
LB: loop body
LE: loop exit
PB: predicated region body
PF: predicated region fallthrough
CT: control target
= control target key end

     0   :  { %9 = vsyncpa [#allocation5], 0  ;;  %s1291_s0 = inlined_call_operand.hbm [shape: f32[16,8,32], index: 0, kind: input, shape index: {}]   ;;  %s1292_s1 = inlined_call_operand.vmem [shape: f32[16,32], index: 1, kind: input, shape index: {}]   ;;  %s1293_s2 = inlined_call_operand.hbm [shape: f32[16,32], index: 2, kind: input, shape index: {}]   ;;  %s1294_s3 = inlined_call_operand.vmem [shape: f32[16,1], index: 3, kind: input, shape index: {}]   ;;  %s1295_s4 = inlined_call_operand.hbm [shape: f32[1,1], index: 4, kind: output, shape index: {}]  }
   0x1   :  { %11 = vsyncpa [#allocation5 + $0x1], 0 }
   0x2   :  { %12 = vsyncpa [#allocation8], 0 }
   0x3   :  { %14 = vsyncpa [#allocation8 + $0x1], 0 }
   0x4   :  { %15 = vsyncpa [#allocation6], 0  ;;  %s1049_s15 = smov 0   ;;  %s1051_s16 = smov 0  }
   0x5   :  { %s1053_s17 = smov 0   ;;  %s1055_s18 = smov 0  }
   0x6 LB: > { %s1068_s19 = sadd.s32 4294967295, %s1015_s18   ;;  %s1071_s20 = sadd.s32 1, %s1015_s18   ;;  %s1015_s18 = sphi %s1055_s18, %s1308_s18   ;;  %s1011_s17 = sphi %s1053_s17, %s1307_s17   ;;  %s1007_s16 = sphi %s1051_s16, %s1306_s16   ;;  %s1003_s15 = sphi %s1049_s15, %s1305_s15  }
   0x7   : > { %s25_s21 = ssub.s32 %s1015_s18, %s1071_s20  ;;  %s28_s22 = sadd.s32 1, %s1011_s17 }
   0x8   : > { %p26_p0 = scmp.eq.s32.totalorder %s25_s21, 0  ;;  %p35_p1 = scmp.ne.s32.totalorder %s1011_s17, %s1007_s16 }
   0x9   : > { %p36_p2 = scmp.eq.s32.totalorder %s1015_s18, 0  ;;  %p41_p3 = scmp.ne.s32.totalorder %s1007_s16, %s1003_s15 }
   0xa   : > { %s1081_s23 = scalar_select %p26_p0, %s1011_s17, %s28_s22  }
   0xb   : > { %p37_p4 = por %p36_p2, %p35_p1  ;;  %p42_p5 = scmp.eq.s32.totalorder %s1068_s19, 0 }
   0xc   : > { %p845_p6 = scmp.lt.s32.totalorder %s1015_s18, 2  ;;  %s1090_s25 = sand.u32 1, %s1011_s17  }
   0xd   : > { %p1085_p7 = por %p42_p5, %p41_p3  ;;  %s811_s26 = sshll.u32 %s1090_s25, 6 }
   0xe   : > { %s829_s27 = sshll.u32 %s1015_s18, 10  ;;  %s168_s5 = scalar_lea.vmem [#allocation4], %s811_s26 }
   0xf   : > { %s1297_s24 = scalar_select %p1085_p7, 1, 0 }
  0x10   : > { %s1097_s30 = scalar_lea.hbm %s1291_s0, %s829_s27  ;;  %s175_s6 = sshll.u32 %s168_s5, 4  ;;  %s1099_s6 = int_to_ptr.vmem [resolvable:$true] %s175_s6 }
  0x11   : > { %p1101_p8 = pnand %p845_p6, %p37_p4  ;;  %s165_s8 = scalar_lea.sflag [#allocation5], %s1090_s25 }
  0x12   : > { %s893_s9 = scalar_lea.hbm %s1097_s30, 1024  ;;  %s898_s12 = scalar_lea.hbm %s1291_s0, 2048 }
  0x13   : > { %p894_p10 = scmp.ne.s32.totalorder %s1097_s30, %s893_s9  ;;  %p895_p11 = pneg %p1101_p8 }
  0x14   : > { %p899_p0 = scmp.lt.s32.totalorder %s1097_s30, %s1291_s0  ;;  %p900_p1 = scmp.lt.s32.totalorder %s898_s12, %s893_s9 }
  0x15   : > { %p896_p12 = pnand %p895_p11, %p894_p10 }
  0x16   : > { %p901_p2 = por %p900_p1, %p899_p0 }
  0x17   : > { %p897_p13 = pneg %p896_p12 }
  0x19   : > { %p902_p3 = pnand %p901_p2, %p897_p13 }
  0x1b   : > { %905 = shalt.err (!%p902_p3)
}
  0x1c   : > { %s906_s15 = scalar_lea.vmem %s1099_s6, 1024  ;;  %s1017_s21 = smov [#allocation4]  }
  0x1d   : > { %p907_p4 = scmp.ne.s32.totalorder %s1099_s6, %s906_s15  ;;  %s911_s22 = sshll.u32 %s1017_s21, 4  ;;  %s912_s22 = int_to_ptr.vmem [resolvable:$false] %s911_s22 }
  0x1e   : > { %s913_s26 = scalar_lea.vmem %s912_s22, 2048  ;;  %p914_p10 = scmp.lt.s32.totalorder %s1099_s6, %s912_s22 }
  0x1f   : > { %p909_p5 = pnand %p907_p4, %p895_p11  ;;  %p915_p12 = scmp.lt.s32.totalorder %s913_s26, %s906_s15 }
  0x21   : > { %p910_p6 = pneg %p909_p5  ;;  %p916_p9 = por %p915_p12, %p914_p10 }
  0x23   : > { %p917_p0 = pnand %p916_p9, %p910_p6 }
  0x25   : > { %920 = shalt.err (!%p917_p0)
}
  0x26   : > { %s1018_s27 = smov 128   ;;  %s1019_s28 = smov 8  }
  0x27   : > { %841 = dma.hbm_to_vmem [thread:$0]  (!%p1101_p8), %s1097_s30, 1024, %s1099_s6, %s165_s8, %s1018_s27, %s1018_s27, %s1019_s28  }
  0x28   : > { %p215_p13 = scmp.lt.s32.totalorder %s1015_s18, 3  ;;  %s814_s29 = sshll.u32 %s1090_s25, 3 }
  0x29   : > { %s815_s5 = sshll.u32 %s1015_s18, 7  ;;  %p1299_p9 = scmp.ge.s32.totalorder %s1015_s18, 1 }
  0x2a   : > { %s1145_s12 = scalar_lea.hbm %s1293_s2, %s815_s5  ;;  %s196_s13 = scalar_lea.vmem [#allocation7], %s814_s29 }
  0x2b   : > { %p1138_p1 = pnand %p1299_p9, %p215_p13  ;;  %s203_s14 = sshll.u32 %s196_s13, 4  ;;  %s204_s14 = int_to_ptr.vmem [resolvable:$true] %s203_s14 }
  0x2c   : > { %s193_s30 = scalar_lea.sflag [#allocation8], %s1090_s25  ;;  %s921_s6 = scalar_lea.hbm %s1145_s12, 128 }
  0x2d   : > { %s1300_s9 = scalar_select %p1138_p1, 1, 0 }
  0x2e   : > { %p922_p2 = scmp.ne.s32.totalorder %s1145_s12, %s921_s6  ;;  %s926_s15 = scalar_lea.hbm %s1293_s2, 256 }
  0x2f   : > { %p927_p5 = scmp.lt.s32.totalorder %s1145_s12, %s1293_s2  ;;  %p928_p6 = scmp.lt.s32.totalorder %s926_s15, %s921_s6 }
  0x30   : > { %p924_p3 = pnand %p922_p2, %p895_p11 }
  0x31   : > { %p929_p10 = por %p928_p6, %p927_p5 }
  0x32   : > { %p925_p4 = pneg %p924_p3 }
  0x34   : > { %p930_p12 = pnand %p929_p10, %p925_p4 }
  0x36   : > { %933 = shalt.err (!%p930_p12)
}
  0x37   : > { %s934_s26 = scalar_lea.vmem %s204_s14, 128  ;;  %s1020_s25 = smov [#allocation7]  }
  0x38   : > { %p935_p0 = scmp.ne.s32.totalorder %s204_s14, %s934_s26  ;;  %s939_s27 = sshll.u32 %s1020_s25, 4  ;;  %s940_s27 = int_to_ptr.vmem [resolvable:$false] %s939_s27 }
  0x39   : > { %s941_s28 = scalar_lea.vmem %s940_s27, 256  ;;  %p942_p2 = scmp.lt.s32.totalorder %s204_s14, %s940_s27 }
  0x3a   : > { %p937_p13 = pnand %p935_p0, %p895_p11  ;;  %p943_p3 = scmp.lt.s32.totalorder %s941_s28, %s934_s26 }
  0x3c   : > { %p938_p9 = pneg %p937_p13  ;;  %p944_p7 = por %p943_p3, %p942_p2 }
  0x3e   : > { %p945_p1 = pnand %p944_p7, %p938_p9 }
  0x40   : > { %948 = shalt.err (!%p945_p1)
}
  0x41   : > { %844 = dma.hbm_to_vmem [thread:$0]  (!%p1101_p8), %s1145_s12, 128, %s204_s14, %s193_s30  }
  0x42   : > { %p1301_p4 = scmp.ne.s32.totalorder %s1300_s9, 0 }
  0x43   : > { %s221_s29 = sand.u32 (!%p1301_p4), 1, %s1007_s16   ;;  %p1302_p11 = scmp.ne.s32.totalorder (!%p1301_p4), %s1297_s24, 0 }
  0x44   : > { %219 = sbr.rel (%p1301_p4) target bundleno = 505 (0x1f9), region = 36  ;;  %s817_s5 = sshll.u32 (!%p1301_p4), %s221_s29, 6 }
  0x45   : > { %s222_s10 = scalar_lea.sflag (!%p1301_p4), [#allocation5], %s221_s29  ;;  %s1169_s11 = scalar_lea.vmem (!%p1301_p4), [#allocation4], %s817_s5 }
  0x49   : > { %990 = dma.done.wait (%p1302_p11), %s222_s10, 1024  }
  0x4a   : > { %992 = vsyncadd (%p1302_p11), %s222_s10, 4294966272  ;;  %s818_s13 = sshll.u32 %s221_s29, 3  ;;  %s231_s7 = scalar_lea.sflag [#allocation8], %s221_s29 }
  0x4b   : > { %s234_s6 = scalar_lea.vmem [#allocation7], %s818_s13 }
  0x4c   : > { %994 = dma.done.wait (%p1302_p11), %s231_s7, 128  }
  0x4d   : > { %996 = vsyncadd (%p1302_p11), %s231_s7, 4294967168  ;;  %p268_p7 = scmp.lt.s32.totalorder %s1068_s19, 1  ;;  %p821_p8 = scmp.ne.s32.totalorder %s1068_s19, 0 }
  0x4f   : > { %s269_s9 = scalar_select %p268_p7, %s1068_s19, 1 }
  0x50   : > { %279 = sbr.rel (%p821_p8) target bundleno = 87 (0x57), region = 48 }
  0x51   : > { %s819_s12 = sshll.u32 %s269_s9, 3 }
  0x52   : > { %s271_s18 = scalar_lea.vmem %s1292_s1, %s819_s12  ;;  %s1187_s21 = scalar_lea.vmem %s1294_s3, %s819_s12 }
  0x55   : > { %vm280_vm0 = vcmask 0   ;;  %v1021_v0 = vmov 0.0  }
  0x56   : > { %281 = vst.msk [vmem:[#allocation2] sm:$0x1] %vm280_vm0, %v1021_v0  ;;  %282 = vst.msk [vmem:[#allocation3] sm:$0x1] %vm280_vm0, %v1021_v0 }
  0x57 PF: > { %v299_v1 = vlaneseq  ;;  %v1022_v2 = vmov 1966171168   ;;  %v292_v4 = vld [vmem:[%s234_s6] sm:$0xff]  ;;  %vm392_vm1 = vcmask 261120   ;;  %v285_v49 = vld [vmem:[%s1169_s11 + $0x10] sm:$0xff]  ;;  %v286_v63 = vld [vmem:[%s1169_s11 + $0x18] sm:$0xff] }
  0x58   : > { %v297_v3 = vunpack.c.l.s4 %v1022_v2  ;;  %v291_v6 = vld [vmem:[%s271_s18] sm:$0xff]  ;;  %v418_v8 = vcombine.high %v292_v4, %v292_v4  ;;  %v284_v38 = vld [vmem:[%s1169_s11 + $0x8] sm:$0xff]  ;;  %vm581_vm2 = vcmask 1041409   ;;  %vm583_vm3 = vcmask 1042434   ;;  %s822_s24 = sshll.u32 %s1068_s19, 3  ;;  %p824_p1 = scmp.ne.s32.totalorder %s1068_s19, 1 }
  0x59   : > { %v1191_v5 = vshrl.u32 %v299_v1, 7  ;;  %v295_v9 = vcombine.high %v291_v6, %v291_v6  ;;  %v283_v20 = vld [vmem:[%s1169_s11] sm:$0xff]  ;;  %v288_v60 = vld [vmem:[%s1169_s11 + $0x28] sm:$0xff]  ;;  %vm585_vm4 = vcmask 1043459   ;;  %vm587_vm5 = vcmask 1044484  }
  0x5a   : > { %v298_v7 = vunpack.c.0.s8 %v297_v3  ;;  %v287_v21 = vld [vmem:[%s1169_s11 + $0x20] sm:$0xff]  ;;  %vm589_vm6 = vcmask 1045509   ;;  %vm591_vm7 = vcmask 1046534   ;;  %vm593_vm8 = vcmask 1047559  }
  0x5b   : > { %v1195_v11 = vsub.s32 0, %v1191_v5  ;;  %vm596_vm9 = vcmask 64512   ;;  %vm674_vm12 = vcmask 7168   ;;  %vm683_vm14 = vcmask 0  }
  0x5c   : > { %v301_v10 = vsub.s32 %v298_v7, %v1191_v5 }
  0x5e   : > { %v425_v12 = vrot.slane %v292_v4, %v301_v10  ;;  %v302_v13 = vrot.slane %v291_v6, %v301_v10  ;;  %v432_v14 = vrot.slane %v418_v8, %v301_v10  ;;  %v309_v15 = vrot.slane %v295_v9, %v301_v10 }
  0x60   : > { %v441_v16 = vrot.slane %v425_v12, %v301_v10  ;;  %v318_v17 = vrot.slane %v302_v13, %v301_v10  ;;  %v1197_v18 = vrot.slane %v432_v14, %v301_v10  ;;  %v1199_v19 = vrot.slane %v309_v15, %v301_v10 }
  0x61   : > { %v433_v22 = vcombine.high %v425_v12, %v425_v12  ;;  %v310_v23 = vcombine.high %v302_v13, %v302_v13  ;;  %v434_v24 = vcombine.high %v432_v14, %v432_v14  ;;  %v311_v25 = vcombine.high %v309_v15, %v309_v15 }
  0x62   : > { %v470_v26 = vrot.slane %v441_v16, %v1195_v11  ;;  %v347_v27 = vrot.slane %v318_v17, %v1195_v11  ;;  %v486_v28 = vrot.slane %v1197_v18, %v1195_v11  ;;  %v363_v29 = vrot.slane %v1199_v19, %v1195_v11 }
  0x63   : > { %v455_v30 = vrot.slane %v433_v22, %v301_v10  ;;  %v332_v31 = vrot.slane %v310_v23, %v301_v10  ;;  %v463_v32 = vcombine.high %v441_v16, %v441_v16  ;;  %v340_v33 = vcombine.high %v318_v17, %v318_v17  ;;  %v289_v17 = vld [vmem:[%s1169_s11 + $0x30] sm:$0xff] }
  0x64   : > { %v507_v34 = vmul.f32 %v470_v26, %v283_v20  ;;  %v384_v35 = vmul.f32 %v347_v27, %v283_v20  ;;  %v511_v36 = vmul.f32 %v486_v28, %v287_v21  ;;  %v388_v37 = vmul.f32 %v363_v29, %v287_v21 }
  0x65   : > { %v474_v39 = vrot.slane %v455_v30, %v1195_v11  ;;  %v351_v40 = vrot.slane %v332_v31, %v1195_v11  ;;  %v478_v45 = vrot.slane %v463_v32, %v1195_v11  ;;  %v355_v46 = vrot.slane %v340_v33, %v1195_v11 }
  0x66   : > { %v515_v41 = vsel %vm392_vm1, %v507_v34, 0.0  ;;  %v393_v42 = vsel %vm392_vm1, %v384_v35, 0.0  ;;  %v527_v43 = vsel %vm392_vm1, %v511_v36, 0.0  ;;  %v405_v44 = vsel %vm392_vm1, %v388_v37, 0.0 }
  0x67   : > { %516 = vadd.xlane.f32.xlu1 %v515_v41  ;;  %394 = vadd.xlane.f32.xlu0 %v393_v42  ;;  %v508_v47 = vmul.f32 %v474_v39, %v284_v38  ;;  %v385_v48 = vmul.f32 %v351_v40, %v284_v38  ;;  %v462_v50 = vrot.slane %v434_v24, %v301_v10  ;;  %v290_v24 = vld [vmem:[%s1169_s11 + $0x38] sm:$0xff]  ;;  %v548_v36 = vand.u32 127, %v299_v1 }
  0x68   : > { %v339_v51 = vrot.slane %v311_v25, %v301_v10  ;;  %v465_v52 = vcombine.high %v455_v30, %v455_v30  ;;  %v509_v53 = vmul.f32 %v478_v45, %v285_v49  ;;  %v386_v54 = vmul.f32 %v355_v46, %v285_v49 }
  0x69   : > { %v342_v55 = vcombine.high %v332_v31, %v332_v31  ;;  %v518_v56 = vsel %vm392_vm1, %v508_v47, 0.0  ;;  %v396_v57 = vsel %vm392_vm1, %v385_v48, 0.0  ;;  %v490_v58 = vrot.slane %v462_v50, %v1195_v11 }
  0x6a   : > { %v367_v59 = vrot.slane %v339_v51, %v1195_v11  ;;  %v482_v61 = vrot.slane %v465_v52, %v1195_v11  ;;  %v521_v62 = vsel %vm392_vm1, %v509_v53, 0.0  ;;  %v464_v2 = vcombine.high %v1197_v18, %v1197_v18 }
  0x6b   : > { %528 = vadd.xlane.f32.xlu1 %v527_v43  ;;  %406 = vadd.xlane.f32.xlu0 %v405_v44  ;;  %v359_v0 = vrot.slane %v342_v55, %v1195_v11  ;;  %v399_v3 = vsel %vm392_vm1, %v386_v54, 0.0  ;;  %v512_v4 = vmul.f32 %v490_v58, %v288_v60  ;;  %v341_v7 = vcombine.high %v1199_v19, %v1199_v19 }
  0x6c   : > { %v389_v6 = vmul.f32 %v367_v59, %v288_v60  ;;  %v510_v8 = vmul.f32 %v482_v61, %v286_v63  ;;  %v494_v10 = vrot.slane %v464_v2, %v1195_v11  ;;  %v466_v12 = vcombine.high %v462_v50, %v462_v50 }
  0x6d   : > { %v387_v9 = vmul.f32 %v359_v0, %v286_v63  ;;  %v530_v13 = vsel %vm392_vm1, %v512_v4, 0.0  ;;  %v371_v15 = vrot.slane %v341_v7, %v1195_v11  ;;  %v343_v16 = vcombine.high %v339_v51, %v339_v51 }
  0x6e   : > { %v408_v14 = vsel %vm392_vm1, %v389_v6, 0.0  ;;  %v524_v18 = vsel %vm392_vm1, %v510_v8, 0.0  ;;  %v498_v19 = vrot.slane %v466_v12, %v1195_v11  ;;  %v513_v21 = vmul.f32 %v494_v10, %v289_v17 }
  0x6f   : > { %519 = vadd.xlane.f32.xlu1 %v518_v56  ;;  %397 = vadd.xlane.f32.xlu0 %v396_v57  ;;  %v402_v20 = vsel %vm392_vm1, %v387_v9, 0.0  ;;  %v390_v22 = vmul.f32 %v371_v15, %v289_v17  ;;  %v375_v23 = vrot.slane %v343_v16, %v1195_v11  ;;  %v551_v39 = vsub.s32 %v548_v36, %v1191_v5 }
  0x70   : > { %v533_v25 = vsel %vm392_vm1, %v513_v21, 0.0  ;;  %v514_v27 = vmul.f32 %v498_v19, %v290_v24  ;;  %v293_v21 = vld [vmem:[%s1187_s21] sm:$0xff] }
  0x71   : > { %v411_v26 = vsel %vm392_vm1, %v390_v22, 0.0  ;;  %v391_v28 = vmul.f32 %v375_v23, %v290_v24 }
  0x72   : > { %v536_v29 = vsel %vm392_vm1, %v514_v27, 0.0 }
  0x73   : > { %522 = vadd.xlane.f32.xlu1 %v521_v62  ;;  %400 = vadd.xlane.f32.xlu0 %v399_v3  ;;  %v414_v30 = vsel %vm392_vm1, %v391_v28, 0.0 }
  0x77   : > { %531 = vadd.xlane.f32.xlu1 %v530_v13  ;;  %409 = vadd.xlane.f32.xlu0 %v408_v14 }
  0x7b   : > { %525 = vadd.xlane.f32.xlu1 %v524_v18  ;;  %403 = vadd.xlane.f32.xlu0 %v402_v20  ;;  %v664_v18 = vstv %s822_s24 }
  0x7c   : > { %v665_v19 = vadd.s32 %v664_v18, %v1191_v5  ;;  %v685_v5 = vld [vmem:[#allocation3] sm:$0x1] }
  0x7e   : > { %v823_v20 = vadd.s32 4294967292, %v665_v19 }
  0x7f   : > { %534 = vadd.xlane.f32.xlu1 %v533_v25  ;;  %412 = vadd.xlane.f32.xlu0 %v411_v26 }
  0x80   : > { %vm667_vm10 = vcmp.ge.s32.totalorder %v823_v20, 0  ;;  %vm668_vm11 = vcmp.lt.s32.totalorder %v823_v20, 12 }
  0x81   : > { %vm1252_vm13 = vmand %vm667_vm10, %vm668_vm11 }
  0x82   : > { %v670_v23 = vsel %vm1252_vm13, %v293_v21, 0.0 }
  0x83   : > { %537 = vadd.xlane.f32.xlu1 %v536_v29  ;;  %415 = vadd.xlane.f32.xlu0 %v414_v30  ;;  %v686_v24 = vsel %vm674_vm12, %v670_v23, 0.0 }
  0x84   : > { %v687_v25 = vrot.slane %v686_v24, 4 }
  0x86   : > { %v688_v26 = vadd.f32 %v687_v25, %v686_v24 }
  0x88   : > { %v689_v27 = vrot.slane %v688_v26, 2 }
  0x8a   : > { %v690_v28 = vadd.f32 %v689_v27, %v688_v26 }
  0x8c   : > { %v691_v29 = vrot.slane %v690_v28, 1 }
  0x8e   : > { %v692_v30 = vadd.f32 %v691_v29, %v690_v28 }
  0xf0   : > { %v517_v31 = vpop.xlane.xlu1 %516  ;;  %v395_v32 = vpop.xlane.xlu0 %394 }
  0xf1   : > { %v611_v46 = vrot.slane %v517_v31, %v551_v39  ;;  %v552_v47 = vrot.slane %v395_v32, %v551_v39  ;;  %v693_v31 = vadd.f32 %v692_v30, %v685_v5 }
  0xf3   : > { %694 = vst.msk [vmem:[#allocation3] sm:$0x1] %vm683_vm14, %v693_v31 }
  0xf4   : > { %v529_v11 = vpop.xlane.xlu1 %528  ;;  %v407_v33 = vpop.xlane.xlu0 %406 }
  0xf5   : > { %v627_v53 = vrot.slane %v529_v11, %v551_v39  ;;  %v568_v54 = vrot.slane %v407_v33, %v551_v39 }
  0xf8   : > { %v520_v34 = vpop.xlane.xlu1 %519  ;;  %v398_v35 = vpop.xlane.xlu0 %397 }
  0xf9   : > { %v615_v42 = vrot.slane %v520_v34, %v551_v39  ;;  %v556_v43 = vrot.slane %v398_v35, %v551_v39 }
  0xfb   : > { %v640_v50 = vsel %vm581_vm2, %v615_v42, %v611_v46  ;;  %v582_v1 = vsel %vm581_vm2, %v556_v43, %v552_v47 }
  0xfc   : > { %v523_v37 = vpop.xlane.xlu1 %522  ;;  %v401_v38 = vpop.xlane.xlu0 %400 }
  0xfd   : > { %v619_v44 = vrot.slane %v523_v37, %v551_v39  ;;  %v560_v45 = vrot.slane %v401_v38, %v551_v39 }
  0xff   : > { %v641_v55 = vsel %vm583_vm3, %v619_v44, %v640_v50  ;;  %v584_v56 = vsel %vm583_vm3, %v560_v45, %v582_v1  ;;  %v671_v1 = vld [vmem:[#allocation2] sm:$0x1] }
 0x100   : > { %v532_v40 = vpop.xlane.xlu1 %531  ;;  %v410_v41 = vpop.xlane.xlu0 %409 }
 0x101   : > { %v631_v63 = vrot.slane %v532_v40, %v551_v39  ;;  %v572_v0 = vrot.slane %v410_v41, %v551_v39 }
 0x104   : > { %v526_v48 = vpop.xlane.xlu1 %525  ;;  %v404_v49 = vpop.xlane.xlu0 %403 }
 0x105   : > { %v623_v51 = vrot.slane %v526_v48, %v551_v39  ;;  %v564_v52 = vrot.slane %v404_v49, %v551_v39 }
 0x107   : > { %v642_v57 = vsel %vm585_vm4, %v623_v51, %v641_v55  ;;  %v586_v58 = vsel %vm585_vm4, %v564_v52, %v584_v56 }
 0x108   : > { %v643_v59 = vsel %vm587_vm5, %v627_v53, %v642_v57  ;;  %v588_v60 = vsel %vm587_vm5, %v568_v54, %v586_v58  ;;  %v535_v61 = vpop.xlane.xlu1 %534  ;;  %v413_v62 = vpop.xlane.xlu0 %412 }
 0x109   : > { %v635_v2 = vrot.slane %v535_v61, %v551_v39  ;;  %v576_v3 = vrot.slane %v413_v62, %v551_v39  ;;  %v644_v4 = vsel %vm589_vm6, %v631_v63, %v643_v59  ;;  %v590_v6 = vsel %vm589_vm6, %v572_v0, %v588_v60 }
 0x10b   : > { %v645_v12 = vsel %vm591_vm7, %v635_v2, %v644_v4  ;;  %v592_v13 = vsel %vm591_vm7, %v576_v3, %v590_v6 }
 0x10c   : > { %v538_v7 = vpop.xlane.xlu1 %537  ;;  %v416_v8 = vpop.xlane.xlu0 %415 }
 0x10d   : > { %v639_v9 = vrot.slane %v538_v7, %v551_v39  ;;  %v580_v10 = vrot.slane %v416_v8, %v551_v39 }
 0x10f   : > { %v646_v14 = vsel %vm593_vm8, %v639_v9, %v645_v12  ;;  %v594_v15 = vsel %vm593_vm8, %v580_v10, %v592_v13 }
 0x110   : > { %v648_v16 = vsel %vm596_vm9, %v646_v14, -inf  ;;  %v597_v17 = vsel %vm596_vm9, %v594_v15, -inf }
 0x111   : > { %649 = vmax.xlane.f32.xlu1 %v648_v16  ;;  %598 = vmax.xlane.f32.xlu0 %v597_v17 }
 0x19a   : > { %v650_v32 = vpop.xlane.xlu1 %649  ;;  %v599_v11 = vpop.xlane.xlu0 %598 }
 0x19b   : > { %v651_v33 = vsub.f32 %v650_v32, %v599_v11 }
 0x19d   : > { %v653_v34 = vand.u32 2147483647, %v651_v33  ;;  %v652_v40 = vmax.f32 %v651_v33, 0.0 }
 0x19f   : > { %v654_v35 = vsub.f32 0.0, %v653_v34 }
 0x1a1   : > { %v655_v36 = vmul.f32 1.442695, %v654_v35 }
 0x1a3   : > { %887 = vpow2.f32 %v655_v36 }
 0x1b0   : > { %v888_v37 = vpop.eup %887 }
 0x1b1   : > { %v657_v38 = vadd.f32 1.0, %v888_v37 }
 0x1b3   : > { %889 = vlog2.f32 %v657_v38 }
 0x1c0   : > { %v890_v39 = vpop.eup %889 }
 0x1c1   : > { %v659_v41 = vmul.f32 0.6931472, %v890_v39 }
 0x1c3   : > { %v660_v42 = vadd.f32 %v659_v41, %v652_v40 }
 0x1c5   : > { %v672_v43 = vsel %vm1252_vm13, %v660_v42, 0.0 }
 0x1c6   : > { %v673_v44 = vmul.f32 %v672_v43, %v670_v23 }
 0x1c8   : > { %v675_v45 = vsel %vm674_vm12, %v673_v44, 0.0 }
 0x1c9   : > { %v676_v46 = vrot.slane %v675_v45, 4 }
 0x1cb   : > { %v677_v47 = vadd.f32 %v676_v46, %v675_v45 }
 0x1cd   : > { %v678_v48 = vrot.slane %v677_v47, 2 }
 0x1cf   : > { %v679_v49 = vadd.f32 %v678_v48, %v677_v47 }
 0x1d1   : > { %v680_v50 = vrot.slane %v679_v49, 1 }
 0x1d3   : > { %v681_v51 = vadd.f32 %v680_v50, %v679_v49  ;;  %698 = sbr.rel (%p824_p1) target bundleno = 490 (0x1ea), region = 52 }
 0x1d5   : > { %v682_v52 = vadd.f32 %v681_v51, %v671_v1 }
 0x1d7   : > { %684 = vst.msk [vmem:[#allocation2] sm:$0x1] %vm683_vm14, %v682_v52 }
 0x1d8   : > { %v700_v53 = vld [vmem:[#allocation3] sm:$0x1] }
 0x1d9   : > { %891 = vrcp.f32 %v700_v53 }
 0x1de   : > { %v699_v54 = vld [vmem:[#allocation2] sm:$0x1] }
 0x1e6   : > { %v892_v55 = vpop.eup %891 }
 0x1e7   : > { %v702_v56 = vmul.f32 %v892_v55, %v699_v54 }
 0x1e9   : > { %703 = vst.msk [vmem:[#allocation9] sm:$0x1] %vm683_vm14, %v702_v56 }
 0x1ea PF: > { %p846_p5 = scmp.eq.s32.totalorder %s1068_s19, 1  ;;  %s1023_s22 = smov [#allocation9]  }
 0x1eb   : > { %s711_s26 = sshll.u32 %s1023_s22, 4  ;;  %s712_s26 = int_to_ptr.vmem [resolvable:$true] %s711_s26 }
 0x1ec   : > { %s949_s25 = scalar_lea.vmem %s712_s26, 16  ;;  %s955_s27 = scalar_lea.vmem %s712_s26, 32 }
 0x1ed   : > { %p950_p6 = scmp.ne.s32.totalorder %s712_s26, %s949_s25  ;;  %p956_p0 = scmp.lt.s32.totalorder %s712_s26, %s712_s26 }
 0x1ee   : > { %p957_p13 = scmp.lt.s32.totalorder %s955_s27, %s949_s25 }
 0x1ef   : > { %p951_p10 = pnand %p950_p6, %p846_p5 }
 0x1f0   : > { %p958_p9 = por %p957_p13, %p956_p0 }
 0x1f1   : > { %p952_p12 = pneg %p951_p10 }
 0x1f3   : > { %p959_p2 = pnand %p958_p9, %p952_p12 }
 0x1f5   : > { %962 = shalt.err (!%p959_p2)
}
 0x1f6   : > { %835 = dma.vmem_to_hbm [thread:$0]  (%p846_p5), %s712_s26, 16, %s1295_s4, [#allocation6]  }
 0x1f7   : > { %998 = dma.done.wait (%p846_p5), [#allocation6], 16  }
 0x1f8   : > { %1000 = vsyncadd (%p846_p5), [#allocation6], 4294967280 }
 0x1f9 PF: > { %p18_p3 = scmp.ge.s32.totalorder %s1071_s20, 4   ;;  %s1305_s15 = smov %s1007_s16 }
 0x1fa   : > { %s1306_s16 = smov %s1011_s17  ;;  %s1307_s17 = smov %s1081_s23 }
 0x1fb   : > { %s1308_s18 = smov %s1071_s20  ;;  %20 = sbr.rel (!%p18_p3) target bundleno = 6 (0x6), region = 100 }
 0x200   :  { %724 = vsyncpa [#allocation5], 1 }
 0x201   :  { %726 = vsyncpa [#allocation5 + $0x1], 1 }
 0x202   :  { %727 = vsyncpa [#allocation8], 1 }
 0x203   :  { %729 = vsyncpa [#allocation8 + $0x1], 1 }
 0x204   :  { %730 = vsyncpa [#allocation6], 1 }
 0x205   :  { %732 = vsyncpa [#allocation6 + $0x1], 1 }

</bundles_post_ra>
